<compile_context>
chip_gen: v5e
topology: v5e:2x2
jax: 0.10.0
libtpu: 0.0.40
codegen_flags: <defaults>
</compile_context>

<pallas_src>
import jax
import jax.numpy as jnp
from jax.experimental import pallas as pl
from jax.experimental.pallas import tpu as pltpu

LANE = 128


# ---------------------------------------------------------------------------
# Kernel
# ---------------------------------------------------------------------------
def _make_mlp_kernel(skip_zero_last_dot):
    """Fused 4-layer MLP on one batch tile. Static flag selects whether the
    final (zero-weight) matmul is replaced by a pure bias broadcast."""

    def kernel(x_ref,
               w1_ref, b1_ref,
               w2_ref, b2_ref,
               w3_ref, b3_ref,
               w4_ref, b4_ref,
               o_ref):
        # x streams in unpadded (tb, in_features) f32; cast to bf16 in VMEM.
        x = x_ref[...].astype(jnp.bfloat16)

        h = jnp.dot(x, w1_ref[...], preferred_element_type=jnp.float32) + b1_ref[...]
        h = jnp.maximum(h, 0.0).astype(jnp.bfloat16)

        h = jnp.dot(h, w2_ref[...], preferred_element_type=jnp.float32) + b2_ref[...]
        h = jnp.maximum(h, 0.0).astype(jnp.bfloat16)

        h = jnp.dot(h, w3_ref[...], preferred_element_type=jnp.float32) + b3_ref[...]
        h = jnp.maximum(h, 0.0).astype(jnp.bfloat16)

        if skip_zero_last_dot:
            # ZeroWeightLinear with a frozen all-zero weight: output == bias.
            out = jnp.broadcast_to(b4_ref[...], o_ref.shape).astype(jnp.float32)
        else:
            out = jnp.dot(h, w4_ref[...],
                          preferred_element_type=jnp.float32) + b4_ref[...]
        o_ref[...] = out.astype(o_ref.dtype)

    return kernel


# ---------------------------------------------------------------------------
# Wrapper
# ---------------------------------------------------------------------------
def _round_up(x, m):
    return (x + m - 1) // m * m


def _pad2(a, rows, cols):
    return jnp.pad(a, ((0, rows - a.shape[0]), (0, cols - a.shape[1])))


def linear_net_forward(x, params, *, tile_b=4096, skip_zero_last_dot=False):
    """Run the fused, batch-tiled MLP Pallas kernel.

    x: (B, in_features) float32
    params: (w1, b1, w2, b2, w3, b3, w4, b4); weights (in_features, out_features),
            biases (1, out_features), all float32 (PyTorch-equivalent layout).
    skip_zero_last_dot: static flag; set True only while the ZeroWeightLinear
            weight is known to be all-zero (fresh init) to skip the dead matmul.
    """
    B, in_features = x.shape
    w1, b1, w2, b2, w3, b3, w4, b4 = params
    out_features = w4.shape[-1]

    # Hidden dims (32/64/48) are zero-padded to a lane-dense 128 so the
    # in-VMEM activations stay unmasked; exact through ReLU. The x / out HBM
    # streams stay unpadded in the feature dim (full-dim BlockSpec exception).
    w1p = _pad2(w1, in_features, LANE).astype(jnp.bfloat16)
    b1p = _pad2(b1, 1, LANE)
    w2p = _pad2(w2, LANE, LANE).astype(jnp.bfloat16)
    b2p = _pad2(b2, 1, LANE)
    w3p = _pad2(w3, LANE, LANE).astype(jnp.bfloat16)
    b3p = _pad2(b3, 1, LANE)
    w4p = _pad2(w4, LANE, out_features).astype(jnp.bfloat16)
    b4p = b4.reshape(1, out_features).astype(jnp.float32)

    # Batch tiling: multiple of 8 sublanes; pad rows only if the grid needs it.
    rows8 = _round_up(B, 8)
    tb = min(tile_b, rows8)
    # Big batches: keep grid >= 2 so the "parallel" batch axis can feed both
    # TensorCores on dual-TC chips (v7x). No-op / single tile for small B.
    if rows8 > 512 and tb == rows8:
        tb = _round_up(pl.cdiv(rows8, 2), 8)
    b_padded = _round_up(B, tb)

    x_p = x if b_padded == B else jnp.pad(x, ((0, b_padded - B), (0, 0)))

    grid = (b_padded // tb,)

    flops = 2 * B * (in_features * 32 + 32 * 64 + 64 * 48
                     + (0 if skip_zero_last_dot else 48 * out_features))
    bytes_accessed = (b_padded * in_features * 4          # x stream (f32)
                      + b_padded * out_features * 4       # out stream (f32)
                      + sum(p.size * 2 for p in (w1p, w2p, w3p, w4p))
                      + sum(p.size * 4 for p in (b1p, b2p, b3p, b4p)))
    cost = pl.CostEstimate(flops=int(flops), transcendentals=0,
                           bytes_accessed=int(bytes_accessed))

    resident = lambda i: (0, 0)   # weights / biases: same block for every tile

    out = pl.pallas_call(
        _make_mlp_kernel(skip_zero_last_dot),
        out_shape=jax.ShapeDtypeStruct((b_padded, out_features), jnp.float32),
        grid=grid,
        in_specs=[
            pl.BlockSpec((tb, in_features), lambda i: (i, 0)),   # x tile (pipelined)
            pl.BlockSpec(w1p.shape, resident),
            pl.BlockSpec(b1p.shape, resident),
            pl.BlockSpec(w2p.shape, resident),
            pl.BlockSpec(b2p.shape, resident),
            pl.BlockSpec(w3p.shape, resident),
            pl.BlockSpec(b3p.shape, resident),
            pl.BlockSpec(w4p.shape, resident),
            pl.BlockSpec(b4p.shape, resident),
        ],
        out_specs=pl.BlockSpec((tb, out_features), lambda i: (i, 0)),
        compiler_params=pltpu.CompilerParams(
            dimension_semantics=("parallel",)),
        cost_estimate=cost,
    )(x_p, w1p, b1p, w2p, b2p, w3p, b3p, w4p, b4p)

    return out if b_padded == B else out[:B]


# ---------------------------------------------------------------------------
# Parameter construction (matches LinearNet.__init__)
# ---------------------------------------------------------------------------
def _torch_linear_init(key, fan_in, fan_out):
    """nn.Linear default init analogue (uniform +/- 1/sqrt(fan_in)); weight is
    returned already transposed to (fan_in, fan_out) for x @ W."""
    kw, kb = jax.random.split(key)
    bound = 1.0 / jnp.sqrt(jnp.asarray(fan_in, jnp.float32))
    w = jax.random.uniform(kw, (fan_in, fan_out), jnp.float32, -bound, bound)
    b = jax.random.uniform(kb, (1, fan_out), jnp.float32, -bound, bound)
    return w, b


def make_linear_net_params(key, in_features, out_features, condition="w"):
    k1, k2, k3, kq = jax.random.split(key, 4)

    w1, b1 = _torch_linear_init(k1, in_features, 32)
    w2, b2 = _torch_linear_init(k2, 32, 64)
    w3, b3 = _torch_linear_init(k3, 64, 48)

    # ZeroWeightLinear: weight zeroed.
    w4 = jnp.zeros((48, out_features), jnp.float32)

    if condition == "w":                      # bias_mode == 'qr'
        channels = int(round(float(out_features) ** 0.5))
        assert channels * channels == out_features, "qr mode needs square out_features"
        rand = jax.random.normal(kq, (channels, channels), jnp.float32)
        q, _ = jnp.linalg.qr(rand)
        b4 = q.reshape(1, out_features)
    elif condition == "w - LU":               # bias_mode == 'zero'
        b4 = jnp.zeros((1, out_features), jnp.float32)
    else:
        raise NotImplementedError("Condition not implemented in this script")

    return (w1, b1, w2, b2, w3, b3, w4, b4)


def _reference_forward(x, params):
    """Pure-JAX f32 reference for correctness checking."""
    w1, b1, w2, b2, w3, b3, w4, b4 = params
    h = jnp.maximum(x @ w1 + b1, 0.0)
    h = jnp.maximum(h @ w2 + b2, 0.0)
    h = jnp.maximum(h @ w3 + b3, 0.0)
    return h @ w4 + b4


# ---------------------------------------------------------------------------
if __name__ == "__main__":
    key = jax.random.PRNGKey(0)
    k_params, k_x, k_x2 = jax.random.split(key, 3)

    in_features = 16
    out_features = 16   # channels = 4 -> qr bias of a 4x4 orthogonal matrix
    params = make_linear_net_params(k_params, in_features, out_features,
                                    condition="w")

    # Small case (single tile, no row padding).
    batch = 8
    x = jax.random.normal(k_x, (batch, in_features), jnp.float32)
    out = jax.block_until_ready(linear_net_forward(x, params))
    ref = _reference_forward(x, params)
    assert out.shape == (batch, out_features)
    assert jnp.allclose(out, ref, atol=2e-2, rtol=2e-2)

    # Ragged-batch case exercising a 2-step grid + tail row padding.
    batch2 = 600
    x2 = jax.random.normal(k_x2, (batch2, in_features), jnp.float32)
    out2 = jax.block_until_ready(linear_net_forward(x2, params))
    ref2 = _reference_forward(x2, params)
    assert out2.shape == (batch2, out_features)
    assert jnp.allclose(out2, ref2, atol=2e-2, rtol=2e-2)

    # Frozen-zero-weight fast path: last dot replaced by a bias broadcast.
    out3 = jax.block_until_ready(
        linear_net_forward(x2, params, skip_zero_last_dot=True))
    assert out3.shape == (batch2, out_features)
    assert jnp.allclose(out3, ref2, atol=2e-2, rtol=2e-2)

    print("KERNEL_OK")
</pallas_src>

<mosaic_0001>
module attributes {stable_mosaic.version = 11 : i64} {
  func.func @kernel(%arg0: i32, %arg1: memref<8x16xf32, #tpu.memory_space<vmem>>, %arg2: memref<16x128xbf16, #tpu.memory_space<vmem>>, %arg3: memref<1x128xf32, #tpu.memory_space<vmem>>, %arg4: memref<128x128xbf16, #tpu.memory_space<vmem>>, %arg5: memref<1x128xf32, #tpu.memory_space<vmem>>, %arg6: memref<128x128xbf16, #tpu.memory_space<vmem>>, %arg7: memref<1x128xf32, #tpu.memory_space<vmem>>, %arg8: memref<128x16xbf16, #tpu.memory_space<vmem>>, %arg9: memref<1x16xf32, #tpu.memory_space<vmem>>, %arg10: memref<8x16xf32, #tpu.memory_space<vmem>>) attributes {dimension_semantics = [#tpu.dimension_semantics<parallel>], iteration_bounds = array<i64: 1>, scalar_prefetch = 0 : i64, scratch_operands = 0 : i64, tpu.core_type = #tpu.core_type<tc>, window_params = [{transform_indices = @transform_0, window_bounds = array<i64: 8, 16>}, {pipeline_mode = #tpu.pipeline_mode<synchronous>, transform_indices = @transform_1, window_bounds = array<i64: 16, 128>}, {pipeline_mode = #tpu.pipeline_mode<synchronous>, transform_indices = @transform_2, window_bounds = array<i64: 1, 128>}, {pipeline_mode = #tpu.pipeline_mode<synchronous>, transform_indices = @transform_3, window_bounds = array<i64: 128, 128>}, {pipeline_mode = #tpu.pipeline_mode<synchronous>, transform_indices = @transform_4, window_bounds = array<i64: 1, 128>}, {pipeline_mode = #tpu.pipeline_mode<synchronous>, transform_indices = @transform_5, window_bounds = array<i64: 128, 128>}, {pipeline_mode = #tpu.pipeline_mode<synchronous>, transform_indices = @transform_6, window_bounds = array<i64: 1, 128>}, {pipeline_mode = #tpu.pipeline_mode<synchronous>, transform_indices = @transform_7, window_bounds = array<i64: 128, 16>}, {pipeline_mode = #tpu.pipeline_mode<synchronous>, transform_indices = @transform_8, window_bounds = array<i64: 1, 16>}, {transform_indices = @transform_9, window_bounds = array<i64: 8, 16>}]} {
    %c0 = arith.constant 0 : index
    %c0_0 = arith.constant 0 : index
    %0 = vector.load %arg1[%c0, %c0_0] : memref<8x16xf32, #tpu.memory_space<vmem>>, vector<8x16xf32>
    %1 = arith.truncf %0 : vector<8x16xf32> to vector<8x16xbf16>
    %c0_1 = arith.constant 0 : index
    %c0_2 = arith.constant 0 : index
    %2 = vector.load %arg2[%c0_1, %c0_2] : memref<16x128xbf16, #tpu.memory_space<vmem>>, vector<16x128xbf16>
    %cst = arith.constant dense<0.000000e+00> : vector<8x128xf32>
    %3 = tpu.matmul %1, %2, %cst {dimension_numbers = #tpu.dot_dimension_numbers<[1], [0], [0], [1], [0, 0, 1, 1], [], []>} : vector<8x16xbf16>, vector<16x128xbf16>, vector<8x128xf32> -> vector<8x128xf32>
    %c0_3 = arith.constant 0 : index
    %c0_4 = arith.constant 0 : index
    %4 = vector.load %arg3[%c0_3, %c0_4] : memref<1x128xf32, #tpu.memory_space<vmem>>, vector<1x128xf32>
    %5 = vector.broadcast %4 : vector<1x128xf32> to vector<8x128xf32>
    %6 = arith.addf %3, %5 : vector<8x128xf32>
    %cst_5 = arith.constant 0.000000e+00 : f32
    %7 = vector.broadcast %cst_5 : f32 to vector<8x128xf32>
    %8 = arith.maximumf %6, %7 : vector<8x128xf32>
    %9 = arith.truncf %8 : vector<8x128xf32> to vector<8x128xbf16>
    %c0_6 = arith.constant 0 : index
    %c0_7 = arith.constant 0 : index
    %10 = vector.load %arg4[%c0_6, %c0_7] : memref<128x128xbf16, #tpu.memory_space<vmem>>, vector<128x128xbf16>
    %cst_8 = arith.constant dense<0.000000e+00> : vector<8x128xf32>
    %11 = tpu.matmul %9, %10, %cst_8 {dimension_numbers = #tpu.dot_dimension_numbers<[1], [0], [0], [1], [0, 0, 1, 1], [], []>} : vector<8x128xbf16>, vector<128x128xbf16>, vector<8x128xf32> -> vector<8x128xf32>
    %c0_9 = arith.constant 0 : index
    %c0_10 = arith.constant 0 : index
    %12 = vector.load %arg5[%c0_9, %c0_10] : memref<1x128xf32, #tpu.memory_space<vmem>>, vector<1x128xf32>
    %13 = vector.broadcast %12 : vector<1x128xf32> to vector<8x128xf32>
    %14 = arith.addf %11, %13 : vector<8x128xf32>
    %cst_11 = arith.constant 0.000000e+00 : f32
    %15 = vector.broadcast %cst_11 : f32 to vector<8x128xf32>
    %16 = arith.maximumf %14, %15 : vector<8x128xf32>
    %17 = arith.truncf %16 : vector<8x128xf32> to vector<8x128xbf16>
    %c0_12 = arith.constant 0 : index
    %c0_13 = arith.constant 0 : index
    %18 = vector.load %arg6[%c0_12, %c0_13] : memref<128x128xbf16, #tpu.memory_space<vmem>>, vector<128x128xbf16>
    %cst_14 = arith.constant dense<0.000000e+00> : vector<8x128xf32>
    %19 = tpu.matmul %17, %18, %cst_14 {dimension_numbers = #tpu.dot_dimension_numbers<[1], [0], [0], [1], [0, 0, 1, 1], [], []>} : vector<8x128xbf16>, vector<128x128xbf16>, vector<8x128xf32> -> vector<8x128xf32>
    %c0_15 = arith.constant 0 : index
    %c0_16 = arith.constant 0 : index
    %20 = vector.load %arg7[%c0_15, %c0_16] : memref<1x128xf32, #tpu.memory_space<vmem>>, vector<1x128xf32>
    %21 = vector.broadcast %20 : vector<1x128xf32> to vector<8x128xf32>
    %22 = arith.addf %19, %21 : vector<8x128xf32>
    %cst_17 = arith.constant 0.000000e+00 : f32
    %23 = vector.broadcast %cst_17 : f32 to vector<8x128xf32>
    %24 = arith.maximumf %22, %23 : vector<8x128xf32>
    %25 = arith.truncf %24 : vector<8x128xf32> to vector<8x128xbf16>
    %c0_18 = arith.constant 0 : index
    %c0_19 = arith.constant 0 : index
    %26 = vector.load %arg8[%c0_18, %c0_19] : memref<128x16xbf16, #tpu.memory_space<vmem>>, vector<128x16xbf16>
    %cst_20 = arith.constant dense<0.000000e+00> : vector<8x16xf32>
    %27 = tpu.matmul %25, %26, %cst_20 {dimension_numbers = #tpu.dot_dimension_numbers<[1], [0], [0], [1], [0, 0, 1, 1], [], []>} : vector<8x128xbf16>, vector<128x16xbf16>, vector<8x16xf32> -> vector<8x16xf32>
    %c0_21 = arith.constant 0 : index
    %c0_22 = arith.constant 0 : index
    %28 = vector.load %arg9[%c0_21, %c0_22] : memref<1x16xf32, #tpu.memory_space<vmem>>, vector<1x16xf32>
    %29 = vector.broadcast %28 : vector<1x16xf32> to vector<8x16xf32>
    %30 = arith.addf %27, %29 : vector<8x16xf32>
    %c0_23 = arith.constant 0 : index
    %c0_24 = arith.constant 0 : index
    %31 = vector.load %arg10[%c0_23, %c0_24] : memref<8x16xf32, #tpu.memory_space<vmem>>, vector<8x16xf32>
    tpu.vector_store %arg10[%c0_23, %c0_24], %30 {strides = array<i32>} : memref<8x16xf32, #tpu.memory_space<vmem>>, vector<8x16xf32>,
    return
  }
  func.func @transform_0(%arg0: i32) -> (i32, i32) {
    %c0_i32 = arith.constant 0 : i32
    %c0_i32_0 = arith.constant 0 : i32
    return %arg0, %c0_i32 : i32, i32
  }
  func.func @transform_1(%arg0: i32) -> (i32, i32) {
    %c0_i32 = arith.constant 0 : i32
    %c0_i32_0 = arith.constant 0 : i32
    %c0_i32_1 = arith.constant 0 : i32
    return %c0_i32, %c0_i32_0 : i32, i32
  }
  func.func @transform_2(%arg0: i32) -> (i32, i32) {
    %c0_i32 = arith.constant 0 : i32
    %c0_i32_0 = arith.constant 0 : i32
    %c0_i32_1 = arith.constant 0 : i32
    return %c0_i32, %c0_i32_0 : i32, i32
  }
  func.func @transform_3(%arg0: i32) -> (i32, i32) {
    %c0_i32 = arith.constant 0 : i32
    %c0_i32_0 = arith.constant 0 : i32
    %c0_i32_1 = arith.constant 0 : i32
    return %c0_i32, %c0_i32_0 : i32, i32
  }
  func.func @transform_4(%arg0: i32) -> (i32, i32) {
    %c0_i32 = arith.constant 0 : i32
    %c0_i32_0 = arith.constant 0 : i32
    %c0_i32_1 = arith.constant 0 : i32
    return %c0_i32, %c0_i32_0 : i32, i32
  }
  func.func @transform_5(%arg0: i32) -> (i32, i32) {
    %c0_i32 = arith.constant 0 : i32
    %c0_i32_0 = arith.constant 0 : i32
    %c0_i32_1 = arith.constant 0 : i32
    return %c0_i32, %c0_i32_0 : i32, i32
  }
  func.func @transform_6(%arg0: i32) -> (i32, i32) {
    %c0_i32 = arith.constant 0 : i32
    %c0_i32_0 = arith.constant 0 : i32
    %c0_i32_1 = arith.constant 0 : i32
    return %c0_i32, %c0_i32_0 : i32, i32
  }
  func.func @transform_7(%arg0: i32) -> (i32, i32) {
    %c0_i32 = arith.constant 0 : i32
    %c0_i32_0 = arith.constant 0 : i32
    %c0_i32_1 = arith.constant 0 : i32
    return %c0_i32, %c0_i32_0 : i32, i32
  }
  func.func @transform_8(%arg0: i32) -> (i32, i32) {
    %c0_i32 = arith.constant 0 : i32
    %c0_i32_0 = arith.constant 0 : i32
    %c0_i32_1 = arith.constant 0 : i32
    return %c0_i32, %c0_i32_0 : i32, i32
  }
  func.func @transform_9(%arg0: i32) -> (i32, i32) {
    %c0_i32 = arith.constant 0 : i32
    %c0_i32_0 = arith.constant 0 : i32
    return %arg0, %c0_i32 : i32, i32
  }
}

</mosaic_0001>

<bundles_post_ra>
// kernel: tpu_custom_call.1
= control target key start
LH: loop header
LB: loop body
LE: loop exit
PB: predicated region body
PF: predicated region fallthrough
CT: control target
= control target key end

     0   :  { %14 = vsyncpa [#allocation3], 0  ;;  %s707_s0 = inlined_call_operand.vmem [shape: f32[8,16], index: 0, kind: input, shape index: {}]   ;;  %s708_s1 = inlined_call_operand.hbm [shape: bf16[16,128], index: 1, kind: input, shape index: {}]   ;;  %s709_s2 = inlined_call_operand.vmem [shape: f32[1,128], index: 2, kind: input, shape index: {}]   ;;  %s710_s3 = inlined_call_operand.vmem [shape: bf16[128,128], index: 3, kind: input, shape index: {}]   ;;  %s711_s4 = inlined_call_operand.vmem [shape: f32[1,128], index: 4, kind: input, shape index: {}]   ;;  %s712_s5 = inlined_call_operand.hbm [shape: bf16[128,128], index: 5, kind: input, shape index: {}]   ;;  %s713_s6 = inlined_call_operand.vmem [shape: f32[1,128], index: 6, kind: input, shape index: {}]   ;;  %s714_s7 = inlined_call_operand.vmem [shape: bf16[128,16], index: 7, kind: input, shape index: {}]   ;;  %s715_s8 = inlined_call_operand.vmem [shape: f32[1,16], index: 8, kind: input, shape index: {}]   ;;  %s716_s9 = inlined_call_operand.hbm [shape: f32[8,16], index: 9, kind: output, shape index: {}]  }
   0x1   :  { %15 = vsyncpa [#allocation6], 0 }
   0x2   :  { %16 = vsyncpa [#allocation4], 0  ;;  %s23_s11 = sshll.u32 %s708_s1, 4  ;;  %s578_s12 = smov [#allocation2]   ;;  %s24_s11 = int_to_ptr.hbm [resolvable:$true] %s23_s11 }
   0x3   :  { %s25_s13 = sshll.u32 %s578_s12, 4  ;;  %s42_s16 = sshll.u32 %s712_s5, 4  ;;  %s26_s13 = int_to_ptr.vmem [resolvable:$true] %s25_s13  ;;  %s43_s16 = int_to_ptr.hbm [resolvable:$true] %s42_s16 }
   0x4   :  { %s579_s17 = smov 64   ;;  %s580_s18 = smov 4  }
   0x5   :  { %31 = dma.hbm_to_vmem [thread:$0]  %s24_s11, 128, %s26_s13, [#allocation3], %s579_s17, %s579_s17, %s580_s18  }
   0x6   :  { %s581_s19 = smov [#allocation5]  }
   0x7   :  { %s44_s20 = sshll.u32 %s581_s19, 4  ;;  %s45_s20 = int_to_ptr.vmem [resolvable:$true] %s44_s20 }
   0x8   :  { %50 = dma.hbm_to_vmem [thread:$0]  %s43_s16, 1024, %s45_s20, [#allocation6], %s579_s17, %s579_s17, %s580_s18  }
   0x9   :  { %572 = dma.done.wait [#allocation3], 128  }
   0xa   :  { %573 = vsyncadd [#allocation3], 4294967168 }
   0xb   :  { %574 = dma.done.wait [#allocation6], 1024  }
   0xc   :  { %575 = vsyncadd [#allocation6], 4294966272  ;;  %v466_v0 = vld [vmem:[#allocation2] sm:$0xff]  ;;  %v474_v2 = vld [vmem:[%s710_s3 + $0x38] sm:$0xff]  ;;  %vm80_vm0 = vcmask 130048   ;;  %s582_s12 = smov [#allocation7]  }
   0xd   :  { %v66_v1 = vld [vmem:[%s707_s0] sm:$0xff]  ;;  %91 = vmatpush.bf16.msra.mxu0 %v466_v0  ;;  %167 = vmatpush.bf16.msra.mxu1 %v474_v2  ;;  %v473_v4 = vld [vmem:[%s710_s3 + $0x30] sm:$0xff]  ;;  %v472_v5 = vld [vmem:[%s710_s3 + $0x28] sm:$0xff]  ;;  %s352_s13 = sshll.u32 %s582_s12, 4  ;;  %s353_s13 = int_to_ptr.vmem [resolvable:$true] %s352_s13 }
   0xe   :  { %v67_v3 = vpack.c.bf16 %v66_v1, %v66_v1  ;;  %v471_v6 = vld [vmem:[%s710_s3 + $0x20] sm:$0xff]  ;;  %v470_v7 = vld [vmem:[%s710_s3 + $0x18] sm:$0xff]  ;;  %v469_v8 = vld [vmem:[%s710_s3 + $0x10] sm:$0xff] }
   0xf   :  { %v468_v9 = vld [vmem:[%s710_s3 + $0x8] sm:$0xff]  ;;  %v467_v10 = vld [vmem:[%s710_s3] sm:$0xff]  ;;  %v481_v12 = vld [vmem:[#allocation5 + $0x30] sm:$0xff] }
  0x10   :  { %369 = vmatmul.msk.bf16.vlgmr.msra.gmra.mxu0 %vm80_vm0, %v67_v3  ;;  %v482_v11 = vld [vmem:[#allocation5 + $0x38] sm:$0xff]  ;;  %v480_v13 = vld [vmem:[#allocation5 + $0x28] sm:$0xff]  ;;  %v479_v14 = vld [vmem:[#allocation5 + $0x20] sm:$0xff] }
  0x11   :  { %168 = vmatpush.bf16.msra.mxu1 %v473_v4  ;;  %250 = vmatpush.bf16.msra.mxu2 %v482_v11  ;;  %v478_v15 = vld [vmem:[#allocation5 + $0x18] sm:$0xff]  ;;  %v477_v16 = vld [vmem:[#allocation5 + $0x10] sm:$0xff]  ;;  %v476_v23 = vld [vmem:[#allocation5 + $0x8] sm:$0xff] }
  0x12   :  { %v496_v17 = vld [vmem:[%s709_s2] ss:$0 sm:$0xff]  ;;  %v475_v24 = vld [vmem:[#allocation5] sm:$0xff]  ;;  %v490_v25 = vld [vmem:[%s714_s7 + $0x38] sm:$0xff] }
  0x13   :  { %333 = vmatpush.bf16.msra.mxu3 %v490_v25  ;;  %v489_v26 = vld [vmem:[%s714_s7 + $0x30] sm:$0xff]  ;;  %v488_v27 = vld [vmem:[%s714_s7 + $0x28] sm:$0xff]  ;;  %v487_v28 = vld [vmem:[%s714_s7 + $0x20] sm:$0xff] }
  0x14   :  { %v486_v29 = vld [vmem:[%s714_s7 + $0x18] sm:$0xff]  ;;  %v485_v30 = vld [vmem:[%s714_s7 + $0x10] sm:$0xff]  ;;  %v497_v31 = vld [vmem:[%s711_s4] ss:$0 sm:$0xff] }
  0x15   :  { %169 = vmatpush.bf16.msra.mxu1 %v472_v5  ;;  %251 = vmatpush.bf16.msra.mxu2 %v481_v12  ;;  %v484_v37 = vld [vmem:[%s714_s7 + $0x8] sm:$0xff]  ;;  %v483_v38 = vld [vmem:[%s714_s7] sm:$0xff]  ;;  %s354_s7 = sshll.u32 %s716_s9, 4  ;;  %s355_s7 = int_to_ptr.hbm [resolvable:$true] %s354_s7 }
  0x16   :  { %v498_v39 = vld [vmem:[%s713_s6] ss:$0 sm:$0xff] }
  0x17   :  { %334 = vmatpush.bf16.msra.mxu3 %v489_v26  ;;  %v499_v45 = vld [vmem:[%s715_s8] ss:$0 sm:$0xff] }
  0x19   :  { %170 = vmatpush.bf16.msra.mxu1 %v471_v6  ;;  %252 = vmatpush.bf16.msra.mxu2 %v480_v13 }
  0x1b   :  { %335 = vmatpush.bf16.msra.mxu3 %v488_v27 }
  0x1d   :  { %171 = vmatpush.bf16.msra.mxu1 %v470_v7  ;;  %253 = vmatpush.bf16.msra.mxu2 %v479_v14 }
  0x1f   :  { %336 = vmatpush.bf16.msra.mxu3 %v487_v28 }
  0x21   :  { %172 = vmatpush.bf16.msra.mxu1 %v469_v8  ;;  %254 = vmatpush.bf16.msra.mxu2 %v478_v15 }
  0x23   :  { %337 = vmatpush.bf16.msra.mxu3 %v486_v29 }
  0x25   :  { %173 = vmatpush.bf16.msra.mxu1 %v468_v9  ;;  %255 = vmatpush.bf16.msra.mxu2 %v477_v16 }
  0x27   :  { %338 = vmatpush.bf16.msra.mxu3 %v485_v30 }
  0x29   :  { %174 = vmatpush.bf16.msra.mxu1 %v467_v10  ;;  %256 = vmatpush.bf16.msra.mxu2 %v476_v23 }
  0x2b   :  { %339 = vmatpush.bf16.msra.mxu3 %v484_v37 }
  0x2d   :  { %257 = vmatpush.bf16.msra.mxu2 %v475_v24 }
  0x2f   :  { %340 = vmatpush.bf16.msra.mxu3 %v483_v38 }
  0x8d   :  { %v93_v18 = vpop.f32.mrf.mxu0 }
  0x8e   :  { %v94_v19 = vadd.f32 %v496_v17, %v93_v18 }
  0x90   :  { %v97_v20 = vmax.f32 %v94_v19, 0.0 }
  0x92   :  { %v98_v21 = vpack.c.bf16 %v97_v20, %v97_v20 }
  0x94   :  { %175 = vmatmul.bf16.vlgmr.msra.gmra.mxu1 %v98_v21 }
  0x95   :  { %v95_v22 = vpop.f32.mrf.mxu0 }
 0x111   :  { %v176_v32 = vpop.f32.mrf.mxu1 }
 0x112   :  { %v177_v33 = vadd.f32 %v497_v31, %v176_v32 }
 0x114   :  { %v180_v34 = vmax.f32 %v177_v33, 0.0 }
 0x116   :  { %v181_v35 = vpack.c.bf16 %v180_v34, %v180_v34 }
 0x118   :  { %258 = vmatmul.bf16.vlgmr.msra.gmra.mxu2 %v181_v35 }
 0x119   :  { %v178_v36 = vpop.f32.mrf.mxu1 }
 0x19b   :  { %v259_v40 = vpop.f32.mrf.mxu2 }
 0x19c   :  { %v260_v41 = vadd.f32 %v498_v39, %v259_v40 }
 0x19e   :  { %v263_v42 = vmax.f32 %v260_v41, 0.0 }
 0x1a0   :  { %v264_v43 = vpack.c.bf16 %v263_v42, %v263_v42 }
 0x1a2   :  { %341 = vmatmul.bf16.vlgmr.msra.gmra.mxu3 %v264_v43 }
 0x1a3   :  { %v261_v44 = vpop.f32.mrf.mxu2 }
 0x225   :  { %v342_v46 = vpop.f32.mrf.mxu3 }
 0x226   :  { %v343_v47 = vadd.f32 %v499_v45, %v342_v46 }
 0x228   :  { %346 = vst.msk [vmem:[#allocation7] sm:$0xff] %vm80_vm0, %v343_v47 }
 0x229   :  { %357 = dma.vmem_to_hbm [thread:$0]  %s353_s13, 128, %s355_s7, [#allocation4]  }
 0x22d   :  { %v344_v48 = vpop.f32.mrf.mxu3 }
 0x22e   :  { %576 = dma.done.wait [#allocation4], 128  }
 0x22f   :  { %577 = vsyncadd [#allocation4], 4294967168 }
 0x230   :  { %362 = vsyncpa [#allocation3], 1 }
 0x231   :  { %363 = vsyncpa [#allocation6], 1 }
 0x232   :  { %364 = vsyncpa [#allocation4], 1 }

</bundles_post_ra>
